<compile_context>
chip_gen: v7x
topology: tpu7x:2x2x1
jax: 0.10.0
libtpu: 0.0.40
codegen_flags: <defaults>
</compile_context>

<pallas_src>
import math

import jax
import jax.numpy as jnp
from jax import lax
from jax.experimental import pallas as pl
from jax.experimental.pallas import tpu as pltpu


def _attn_kernel(x_ref, wp_ref, bp_ref, seg_ref, rb_ref, wo_ref, bo_ref, out_ref):
    cq = seg_ref.shape[0]                       # = r * n_heads * H (section width)

    x = x_ref[...]                              # (bn, r*H) bf16

    # 1) fused projection + lane replication (1/sqrt(hd) already folded in).
    big = jnp.dot(x, wp_ref[...], preferred_element_type=jnp.float32) + bp_ref[...]
    q_rep = big[:, 0 * cq:1 * cq]               # q_i replicated across key-head blocks
    k_til = big[:, 1 * cq:2 * cq]               # k tiled once per query head
    v_til = big[:, 2 * cq:3 * cq]               # v tiled once per query head

    # 2) all nh*nh scores per token, lane-packed, via one MXU matmul.
    prod_qk = (q_rep * k_til).astype(jnp.bfloat16)
    s = jnp.dot(prod_qk, seg_ref[...], preferred_element_type=jnp.float32)

    # 3) softmax over key heads.  Per-row global max is a constant per
    #    softmax group -> identical result, exp arguments <= 0.
    m = jnp.max(s, axis=-1, keepdims=True)
    e = jnp.exp(s - m).astype(jnp.bfloat16)

    #    One matmul yields both the replicated numerators and the replicated
    #    per-query-head denominators.
    rep = jnp.dot(e, rb_ref[...], preferred_element_type=jnp.float32)
    num_rep = rep[:, :cq]
    den_rep = rep[:, cq:]
    w_rep = num_rep * pl.reciprocal(den_rep, approx=True)

    # 4) weighted-V combine folded into the output projection.
    prod_av = (w_rep * v_til).astype(jnp.bfloat16)
    out = jnp.dot(prod_av, wo_ref[...], preferred_element_type=jnp.float32) + bo_ref[...]
    out_ref[...] = out.astype(out_ref.dtype)


def _ortho_loss_kernel(w_ref, loss_ref):
    # Weight-only computation, executed exactly once.  W @ W.T via an NT
    # dot_general so no transposed weight copies are needed.
    # TODO(synk): for very large H, tile the Gram matmuls instead of holding
    # the whole (4, H, H) stack in VMEM.
    H = w_ref.shape[-1]
    rows = lax.broadcasted_iota(jnp.int32, (H, H), 0)
    cols = lax.broadcasted_iota(jnp.int32, (H, H), 1)
    eye = jnp.where(rows == cols, 1.0, 0.0).astype(jnp.float32)

    total = jnp.float32(0.0)
    for l in range(4):
        w = w_ref[l]
        gram = lax.dot_general(w, w, (((1,), (1,)), ((), ())),
                               preferred_element_type=jnp.float32)
        d = gram - eye
        total = total + jnp.sum(d * d)
    loss_ref[0, 0] = total / jnp.float32(H * H)


def _pick_block_rows(n_rows, target):
    bn = min(target, n_rows)
    bn -= bn % 8
    while bn >= 8 and n_rows % bn != 0:
        bn -= 8
    if bn < 8:
        bn = n_rows                 # block == full dim is always legal
    return bn


def disentangled_mha(x, params, n_heads, *, block_rows=512):
    """x: (B, S, H) f32; params: [Wq, bq, Wk, bk, Wv, bv, Wo, bo] (PyTorch layout)."""
    B, S, H = x.shape
    hd = H // n_heads
    N = B * S
    scale = 1.0 / math.sqrt(hd)
    f32 = jnp.float32
    bf16 = jnp.bfloat16

    Wq, bq, Wk, bk, Wv, bv, Wo, bo = [p.astype(f32) for p in params]

    # ---- host-side constant folds (per token, un-packed) --------------------
    nhH = n_heads * H
    col = jnp.arange(nhH)
    row_h = jnp.arange(H)
    # Eq: q -> q_rep (query head i broadcast across the key-head blocks).
    Eq = (row_h[:, None] == ((col // H) * hd + (col % hd))[None, :]).astype(f32)
    # Ek: k / v -> tiled once per query head.
    Ek = (row_h[:, None] == (col % H)[None, :]).astype(f32)
    # SEG: segmented sum of q*k products -> lane-packed (i, j) scores.
    grp = (col // H) * n_heads + ((col % H) // hd)
    SEG = (jnp.arange(n_heads * n_heads)[None, :] == grp[:, None]).astype(f32)
    R = SEG.T                                             # score (i,j) -> block (i,j)
    Rsum = ((jnp.arange(n_heads * n_heads) // n_heads)[:, None]
            == (col // H)[None, :]).astype(f32)           # per-head denominator spread
    Ffold = Eq.T                                          # fold (i,j,d) -> (i,d)

    W_qrep = (Wq.T @ Eq) * scale
    b_qrep = (bq @ Eq) * scale
    W_ktil = Wk.T @ Ek
    b_ktil = bk @ Ek
    W_vtil = Wv.T @ Ek
    b_vtil = bv @ Ek
    W_out = Ffold @ Wo.T                                  # (nhH, H)

    # ---- lane-dense token packing (r tokens per row when H < 128) -----------
    r = 1
    if H < 128 and 128 % H == 0:
        r = 128 // H
        while r > 1 and N % r != 0:
            r //= 2
    I_r = jnp.eye(r, dtype=f32)

    Wp = jnp.concatenate([jnp.kron(I_r, W_qrep),
                          jnp.kron(I_r, W_ktil),
                          jnp.kron(I_r, W_vtil)], axis=1)
    bp = jnp.concatenate([jnp.tile(b_qrep, r),
                          jnp.tile(b_ktil, r),
                          jnp.tile(b_vtil, r)]).reshape(1, -1)
    SEGp = jnp.kron(I_r, SEG)
    RBp = jnp.concatenate([jnp.kron(I_r, R), jnp.kron(I_r, Rsum)], axis=1)
    Woutp = jnp.kron(I_r, W_out)
    bop = jnp.tile(bo, r).reshape(1, -1)

    NP, HP = N // r, r * H
    CQ = r * nhH
    CP = r * n_heads * n_heads

    # bf16 matmul operands, f32 accumulation / biases.
    xp = x.reshape(N, H).astype(bf16).reshape(NP, HP)
    Wp16, SEG16, RB16, Wout16 = (a.astype(bf16) for a in (Wp, SEGp, RBp, Woutp))

    bn = _pick_block_rows(NP, block_rows)
    grid = (NP // bn,)

    # Cost / VMEM bookkeeping.
    const_bytes = 2 * (HP * 3 * CQ + CQ * CP + CP * 2 * CQ + CQ * HP) + 4 * (3 * CQ + HP)
    flops = 2 * NP * (HP * 3 * CQ + CQ * CP + CP * 2 * CQ + CQ * HP)
    transcendentals = NP * (CP + CQ)                      # exp + approx reciprocal
    bytes_accessed = const_bytes + NP * HP * (2 + 4)
    vmem_need = 2 * bn * HP * (2 + 4) + 2 * const_bytes + 8 * bn * 3 * CQ * 4
    vmem_limit = int(min(48 * 2 ** 20, max(32 * 2 ** 20, 2 * vmem_need)))

    # NOTE: the weight / bias / fold-matrix specs use constant index_maps so
    # they stay VMEM-resident and are not re-fetched per grid step.  (On v7x,
    # pl.Buffered(1) on these specs would additionally drop their second
    # pipeline buffer; omitted here to keep lowering maximally portable.)
    out_p = pl.pallas_call(
        _attn_kernel,
        out_shape=jax.ShapeDtypeStruct((NP, HP), f32),
        grid_spec=pltpu.PrefetchScalarGridSpec(
            num_scalar_prefetch=0,
            grid=grid,
            in_specs=[
                pl.BlockSpec((bn, HP), lambda i: (i, 0)),       # x row tile
                pl.BlockSpec((HP, 3 * CQ), lambda i: (0, 0)),   # fused projection weight
                pl.BlockSpec((1, 3 * CQ), lambda i: (0, 0)),    # fused projection bias
                pl.BlockSpec((CQ, CP), lambda i: (0, 0)),       # score segmented-sum matrix
                pl.BlockSpec((CP, 2 * CQ), lambda i: (0, 0)),   # softmax num/den spread matrix
                pl.BlockSpec((CQ, HP), lambda i: (0, 0)),       # AV-fold + output projection
                pl.BlockSpec((1, HP), lambda i: (0, 0)),        # output bias
            ],
            out_specs=pl.BlockSpec((bn, HP), lambda i: (i, 0)),
        ),
        compiler_params=pltpu.CompilerParams(
            dimension_semantics=("parallel",),
            vmem_limit_bytes=vmem_limit),
        cost_estimate=pl.CostEstimate(flops=flops,
                                      transcendentals=transcendentals,
                                      bytes_accessed=bytes_accessed),
    )(xp, Wp16, bp, SEG16, RB16, Wout16, bop)

    out = out_p.reshape(B, S, H)

    # Orthogonality loss: one-shot, weight-only kernel (f32 for accuracy).
    w_stack = jnp.stack([Wq, Wk, Wv, Wo])                  # (4, H, H)
    loss = pl.pallas_call(
        _ortho_loss_kernel,
        out_shape=jax.ShapeDtypeStruct((1, 1), f32),
        in_specs=[pl.BlockSpec(memory_space=pltpu.MemorySpace.VMEM)],
        out_specs=pl.BlockSpec(memory_space=pltpu.MemorySpace.SMEM),
    )(w_stack)

    return out, loss[0, 0]


def reference(x, params, n_heads):
    Wq, bq, Wk, bk, Wv, bv, Wo, bo = params
    B, S, H = x.shape
    hd = H // n_heads
    q = (x @ Wq.T + bq).reshape(B, S, n_heads, hd)
    k = (x @ Wk.T + bk).reshape(B, S, n_heads, hd)
    v = (x @ Wv.T + bv).reshape(B, S, n_heads, hd)
    scores = jnp.einsum('bsid,bsjd->bsij', q, k) / math.sqrt(hd)
    w = jax.nn.softmax(scores, axis=-1)
    attn = jnp.einsum('bsij,bsjd->bsid', w, v).reshape(B, S, H)
    out = attn @ Wo.T + bo
    eye = jnp.eye(H, dtype=jnp.float32)
    loss = sum(jnp.mean((W @ W.T - eye) ** 2) for W in (Wq, Wk, Wv, Wo))
    return out, loss


if __name__ == "__main__":
    B, S, H, N_HEADS = 2, 32, 32, 4

    key = jax.random.PRNGKey(0)
    keys = jax.random.split(key, 9)
    x = jax.random.normal(keys[0], (B, S, H), dtype=jnp.float32)

    # Deterministic nn.Linear-style init: U(-1/sqrt(in), 1/sqrt(in)).
    bound = 1.0 / math.sqrt(H)
    params = []
    for idx in range(4):
        W = jax.random.uniform(keys[1 + 2 * idx], (H, H), jnp.float32, -bound, bound)
        b = jax.random.uniform(keys[2 + 2 * idx], (H,), jnp.float32, -bound, bound)
        params += [W, b]

    # block_rows=8 -> a 2-step "parallel" grid over the 16 packed (lane-dense)
    # rows, exercising the pipeline; the production default is block_rows=512.
    out, loss = disentangled_mha(x, params, N_HEADS, block_rows=8)
    out = jax.block_until_ready(out)
    loss = jax.block_until_ready(loss)

    ref_out, ref_loss = reference(x, params, N_HEADS)
    # bf16 matmul operands (f32 accumulation) -> slightly looser tolerance.
    assert jnp.allclose(out, ref_out, atol=2e-2, rtol=2e-2), "output mismatch"
    assert jnp.allclose(loss, ref_loss, atol=1e-3, rtol=1e-2), "loss mismatch"
    print("KERNEL_OK")
</pallas_src>

<mosaic_0001>
module attributes {stable_mosaic.version = 11 : i64} {
  func.func @_attn_kernel(%arg0: i32, %arg1: memref<8x128xbf16, #tpu.memory_space<vmem>>, %arg2: memref<128x1536xbf16, #tpu.memory_space<vmem>>, %arg3: memref<1x1536xf32, #tpu.memory_space<vmem>>, %arg4: memref<512x64xbf16, #tpu.memory_space<vmem>>, %arg5: memref<64x1024xbf16, #tpu.memory_space<vmem>>, %arg6: memref<512x128xbf16, #tpu.memory_space<vmem>>, %arg7: memref<1x128xf32, #tpu.memory_space<vmem>>, %arg8: memref<8x128xf32, #tpu.memory_space<vmem>>) attributes {dimension_semantics = [#tpu.dimension_semantics<parallel>], iteration_bounds = array<i64: 2>, scalar_prefetch = 0 : i64, scratch_operands = 0 : i64, tpu.core_type = #tpu.core_type<tc>, window_params = [{transform_indices = @transform_0, window_bounds = array<i64: 8, 128>}, {pipeline_mode = #tpu.pipeline_mode<synchronous>, transform_indices = @transform_1, window_bounds = array<i64: 128, 1536>}, {pipeline_mode = #tpu.pipeline_mode<synchronous>, transform_indices = @transform_2, window_bounds = array<i64: 1, 1536>}, {pipeline_mode = #tpu.pipeline_mode<synchronous>, transform_indices = @transform_3, window_bounds = array<i64: 512, 64>}, {pipeline_mode = #tpu.pipeline_mode<synchronous>, transform_indices = @transform_4, window_bounds = array<i64: 64, 1024>}, {pipeline_mode = #tpu.pipeline_mode<synchronous>, transform_indices = @transform_5, window_bounds = array<i64: 512, 128>}, {pipeline_mode = #tpu.pipeline_mode<synchronous>, transform_indices = @transform_6, window_bounds = array<i64: 1, 128>}, {transform_indices = @transform_7, window_bounds = array<i64: 8, 128>}]} {
    %c0 = arith.constant 0 : index
    %c0_0 = arith.constant 0 : index
    %0 = vector.load %arg1[%c0, %c0_0] : memref<8x128xbf16, #tpu.memory_space<vmem>>, vector<8x128xbf16>
    %c0_1 = arith.constant 0 : index
    %c0_2 = arith.constant 0 : index
    %1 = vector.load %arg2[%c0_1, %c0_2] : memref<128x1536xbf16, #tpu.memory_space<vmem>>, vector<128x1536xbf16>
    %cst = arith.constant dense<0.000000e+00> : vector<8x1536xf32>
    %2 = tpu.matmul %0, %1, %cst {dimension_numbers = #tpu.dot_dimension_numbers<[1], [0], [0], [1], [0, 0, 1, 1], [], []>} : vector<8x128xbf16>, vector<128x1536xbf16>, vector<8x1536xf32> -> vector<8x1536xf32>
    %c0_3 = arith.constant 0 : index
    %c0_4 = arith.constant 0 : index
    %3 = vector.load %arg3[%c0_3, %c0_4] : memref<1x1536xf32, #tpu.memory_space<vmem>>, vector<1x1536xf32>
    %4 = vector.broadcast %3 : vector<1x1536xf32> to vector<8x1536xf32>
    %5 = arith.addf %2, %4 : vector<8x1536xf32>
    %6 = vector.extract_strided_slice %5 {offsets = [0, 0], sizes = [8, 512], strides = [1, 1]} : vector<8x1536xf32> to vector<8x512xf32>
    %7 = vector.extract_strided_slice %5 {offsets = [0, 512], sizes = [8, 512], strides = [1, 1]} : vector<8x1536xf32> to vector<8x512xf32>
    %8 = vector.extract_strided_slice %5 {offsets = [0, 1024], sizes = [8, 512], strides = [1, 1]} : vector<8x1536xf32> to vector<8x512xf32>
    %9 = arith.mulf %6, %7 : vector<8x512xf32>
    %10 = arith.truncf %9 : vector<8x512xf32> to vector<8x512xbf16>
    %c0_5 = arith.constant 0 : index
    %c0_6 = arith.constant 0 : index
    %11 = vector.load %arg4[%c0_5, %c0_6] : memref<512x64xbf16, #tpu.memory_space<vmem>>, vector<512x64xbf16>
    %cst_7 = arith.constant dense<0.000000e+00> : vector<8x64xf32>
    %12 = tpu.matmul %10, %11, %cst_7 {dimension_numbers = #tpu.dot_dimension_numbers<[1], [0], [0], [1], [0, 0, 1, 1], [], []>} : vector<8x512xbf16>, vector<512x64xbf16>, vector<8x64xf32> -> vector<8x64xf32>
    %cst_8 = arith.constant dense<0xFF800000> : vector<8xf32>
    %13 = vector.multi_reduction <maximumf>, %12, %cst_8 [1] : vector<8x64xf32> to vector<8xf32>
    %14 = vector.shape_cast %13 : vector<8xf32> to vector<8x1xf32>
    %15 = vector.broadcast %14 : vector<8x1xf32> to vector<8x64xf32>
    %16 = arith.subf %12, %15 : vector<8x64xf32>
    %17 = math.exp %16 : vector<8x64xf32>
    %18 = arith.truncf %17 : vector<8x64xf32> to vector<8x64xbf16>
    %c0_9 = arith.constant 0 : index
    %c0_10 = arith.constant 0 : index
    %19 = vector.load %arg5[%c0_9, %c0_10] : memref<64x1024xbf16, #tpu.memory_space<vmem>>, vector<64x1024xbf16>
    %cst_11 = arith.constant dense<0.000000e+00> : vector<8x1024xf32>
    %20 = tpu.matmul %18, %19, %cst_11 {dimension_numbers = #tpu.dot_dimension_numbers<[1], [0], [0], [1], [0, 0, 1, 1], [], []>} : vector<8x64xbf16>, vector<64x1024xbf16>, vector<8x1024xf32> -> vector<8x1024xf32>
    %21 = vector.extract_strided_slice %20 {offsets = [0, 0], sizes = [8, 512], strides = [1, 1]} : vector<8x1024xf32> to vector<8x512xf32>
    %22 = vector.extract_strided_slice %20 {offsets = [0, 512], sizes = [8, 512], strides = [1, 1]} : vector<8x1024xf32> to vector<8x512xf32>
    %23 = tpu.reciprocal %22 {approx = true} : vector<8x512xf32> -> vector<8x512xf32>
    %24 = arith.mulf %21, %23 : vector<8x512xf32>
    %25 = arith.mulf %24, %8 : vector<8x512xf32>
    %26 = arith.truncf %25 : vector<8x512xf32> to vector<8x512xbf16>
    %c0_12 = arith.constant 0 : index
    %c0_13 = arith.constant 0 : index
    %27 = vector.load %arg6[%c0_12, %c0_13] : memref<512x128xbf16, #tpu.memory_space<vmem>>, vector<512x128xbf16>
    %cst_14 = arith.constant dense<0.000000e+00> : vector<8x128xf32>
    %28 = tpu.matmul %26, %27, %cst_14 {dimension_numbers = #tpu.dot_dimension_numbers<[1], [0], [0], [1], [0, 0, 1, 1], [], []>} : vector<8x512xbf16>, vector<512x128xbf16>, vector<8x128xf32> -> vector<8x128xf32>
    %c0_15 = arith.constant 0 : index
    %c0_16 = arith.constant 0 : index
    %29 = vector.load %arg7[%c0_15, %c0_16] : memref<1x128xf32, #tpu.memory_space<vmem>>, vector<1x128xf32>
    %30 = vector.broadcast %29 : vector<1x128xf32> to vector<8x128xf32>
    %31 = arith.addf %28, %30 : vector<8x128xf32>
    %c0_17 = arith.constant 0 : index
    %c0_18 = arith.constant 0 : index
    %32 = vector.load %arg8[%c0_17, %c0_18] : memref<8x128xf32, #tpu.memory_space<vmem>>, vector<8x128xf32>
    tpu.vector_store %arg8[%c0_17, %c0_18], %31 {strides = array<i32>} : memref<8x128xf32, #tpu.memory_space<vmem>>, vector<8x128xf32>,
    return
  }
  func.func @transform_0(%arg0: i32) -> (i32, i32) {
    %c0_i32 = arith.constant 0 : i32
    %c0_i32_0 = arith.constant 0 : i32
    return %arg0, %c0_i32 : i32, i32
  }
  func.func @transform_1(%arg0: i32) -> (i32, i32) {
    %c0_i32 = arith.constant 0 : i32
    %c0_i32_0 = arith.constant 0 : i32
    %c0_i32_1 = arith.constant 0 : i32
    return %c0_i32, %c0_i32_0 : i32, i32
  }
  func.func @transform_2(%arg0: i32) -> (i32, i32) {
    %c0_i32 = arith.constant 0 : i32
    %c0_i32_0 = arith.constant 0 : i32
    %c0_i32_1 = arith.constant 0 : i32
    return %c0_i32, %c0_i32_0 : i32, i32
  }
  func.func @transform_3(%arg0: i32) -> (i32, i32) {
    %c0_i32 = arith.constant 0 : i32
    %c0_i32_0 = arith.constant 0 : i32
    %c0_i32_1 = arith.constant 0 : i32
    return %c0_i32, %c0_i32_0 : i32, i32
  }
  func.func @transform_4(%arg0: i32) -> (i32, i32) {
    %c0_i32 = arith.constant 0 : i32
    %c0_i32_0 = arith.constant 0 : i32
    %c0_i32_1 = arith.constant 0 : i32
    return %c0_i32, %c0_i32_0 : i32, i32
  }
  func.func @transform_5(%arg0: i32) -> (i32, i32) {
    %c0_i32 = arith.constant 0 : i32
    %c0_i32_0 = arith.constant 0 : i32
    %c0_i32_1 = arith.constant 0 : i32
    return %c0_i32, %c0_i32_0 : i32, i32
  }
  func.func @transform_6(%arg0: i32) -> (i32, i32) {
    %c0_i32 = arith.constant 0 : i32
    %c0_i32_0 = arith.constant 0 : i32
    %c0_i32_1 = arith.constant 0 : i32
    return %c0_i32, %c0_i32_0 : i32, i32
  }
  func.func @transform_7(%arg0: i32) -> (i32, i32) {
    %c0_i32 = arith.constant 0 : i32
    %c0_i32_0 = arith.constant 0 : i32
    return %arg0, %c0_i32 : i32, i32
  }
}

</mosaic_0001>

<bundles_post_ra>
// kernel: tpu_custom_call.1
= control target key start
LH: loop header
LB: loop body
LE: loop exit
PB: predicated region body
PF: predicated region fallthrough
CT: control target
= control target key end

     0   :  { %12 = vsyncpa [#allocation3], 0  ;;  %s3554_s0 = inlined_call_operand.vmem [shape: bf16[16,128], index: 0, kind: input, shape index: {}]   ;;  %s3555_s1 = inlined_call_operand.hbm [shape: bf16[128,1536], index: 1, kind: input, shape index: {}]   ;;  %s3556_s2 = inlined_call_operand.vmem [shape: f32[1,1536], index: 2, kind: input, shape index: {}]   ;;  %s3557_s3 = inlined_call_operand.vmem [shape: bf16[512,64], index: 3, kind: input, shape index: {}]   ;;  %s3558_s4 = inlined_call_operand.vmem [shape: bf16[64,1024], index: 4, kind: input, shape index: {}]   ;;  %s3559_s5 = inlined_call_operand.hbm [shape: bf16[512,128], index: 5, kind: input, shape index: {}]   ;;  %s3560_s6 = inlined_call_operand.vmem [shape: f32[1,128], index: 6, kind: input, shape index: {}]   ;;  %s3561_s7 = inlined_call_operand.hbm [shape: f32[16,128], index: 7, kind: output, shape index: {}]  }
   0x1   :  { %13 = vsyncpa [#allocation6], 0 }
   0x2   :  { %14 = vsyncpa [#allocation4], 0 }
   0x3   :  { %16 = vsyncpa [#allocation4 + $0x1], 0  ;;  %s3116_s24 = smov 0   ;;  %s3118_s25 = smov 0  }
   0x4   :  { %s3120_s26 = smov 0   ;;  %s3122_s27 = smov 0  }
   0x5 LB: > { %s3137_s28 = sadd.s32 4294967295, %s3066_s27   ;;  %s2358_s29 = sadd.s32 4294967294, %s3066_s27   ;;  %s3066_s27 = sphi %s3122_s27, %s3581_s27   ;;  %s3062_s26 = sphi %s3120_s26, %s3580_s26   ;;  %s3058_s25 = sphi %s3118_s25, %s3579_s25   ;;  %s3054_s24 = sphi %s3116_s24, %s3578_s24  }
   0x6   : > { %s3141_s30 = sadd.s32 1, %s3066_s27   ;;  %s181_s8 = sadd.s32 1, %s3062_s26 }
   0x7   : > { %s178_s9 = ssub.s32 %s3066_s27, %s3141_s30  ;;  %p191_p0 = scmp.ne.s32.totalorder %s3062_s26, %s3058_s25 }
   0x8   : > { %p179_p1 = scmp.eq.s32.totalorder %s178_s9, 0  ;;  %p192_p2 = scmp.eq.s32.totalorder %s3137_s28, 1 }
   0x9   : > { %p197_p3 = scmp.ne.s32.totalorder %s3058_s25, %s3054_s24  ;;  %p198_p4 = scmp.eq.s32.totalorder %s2358_s29, 1 }
   0xa   : > { %s3152_s10 = scalar_select %p179_p1, %s3062_s26, %s181_s8  }
   0xb   : > { %p3154_p5 = por %p192_p2, %p191_p0  ;;  %p3158_p6 = por %p198_p4, %p197_p3 }
   0xc   : > { %3565 = sst [smem:[#allocation11_spill]] %s3152_s10  ;;  %p2359_p7 = scmp.ge.s32.totalorder %s3066_s27, 1 }
   0xd   : > { %s3566_s11 = scalar_select %p3154_p5, 1, 0 }
   0xe   : > { %s3567_s12 = scalar_select %p3158_p6, 1, 0 }
   0xf   : > { %p205_p8 = scmp.lt.s32.totalorder %s3066_s27, 3  ;;  %p3562_p9 = scmp.eq.s32.totalorder %s3137_s28, 0 }
  0x10   : > { %s3068_s14 = smov [#allocation2]   ;;  %s3069_s17 = smov [#allocation5]  }
  0x11   : > { %p3165_p10 = pnand %p2359_p7, %p205_p8  ;;  %s217_s15 = sshll.u32 %s3068_s14, 4  ;;  %s218_s15 = int_to_ptr.vmem [resolvable:$true] %s217_s15 }
  0x12   : > { %s239_s18 = sshll.u32 %s3069_s17, 4  ;;  %s2940_s21 = scalar_lea.hbm %s3555_s1, 12288  ;;  %s3177_s18 = int_to_ptr.vmem [resolvable:$true] %s239_s18 }
  0x13   : > { %s3568_s13 = scalar_select %p3165_p10, 1, 0 }
  0x14   : > { %p2667_p11 = pneg %p3165_p10  ;;  %p2941_p13 = scmp.ne.s32.totalorder %s3555_s1, %s2940_s21 }
  0x15   : > { %p2947_p3 = scmp.lt.u32.totalorder %s2940_s21, %s3555_s1 }
  0x16   : > { %p3173_p12 = pnand %p3562_p9, %p2667_p11 }
  0x18   : > { %p2942_p0 = pneg %p3173_p12 }
  0x1a   : > { %p2943_p1 = pnand %p2942_p0, %p2941_p13 }
  0x1c   : > { %p2944_p2 = pneg %p2943_p1 }
  0x1e   : > { %p2949_p4 = pnand %p2947_p3, %p2944_p2 }
  0x20   : > { %2952 = shalt.err (!%p2949_p4)
}
  0x21   : > { %s2953_s9 = scalar_lea.vmem %s218_s15, 12288  ;;  %p2961_p9 = scmp.lt.s32.totalorder %s218_s15, %s218_s15 }
  0x22   : > { %p2954_p7 = scmp.ne.s32.totalorder %s218_s15, %s2953_s9  ;;  %p2962_p6 = scmp.lt.s32.totalorder %s2953_s9, %s2953_s9 }
  0x24   : > { %p2956_p8 = pnand %p2954_p7, %p2942_p0  ;;  %p2963_p5 = por %p2962_p6, %p2961_p9 }
  0x26   : > { %p2957_p11 = pneg %p2956_p8 }
  0x28   : > { %p2964_p10 = pnand %p2963_p5, %p2957_p11 }
  0x2a   : > { %2967 = shalt.err (!%p2964_p10)
}
  0x2b   : > { %s3070_s14 = smov 768   ;;  %s3071_s17 = smov 48  }
  0x2c   : > { %2670 = dma.hbm_to_vmem [thread:$0]  (!%p3173_p12), %s3555_s1, 12288, %s218_s15, [#allocation3], %s3070_s14, %s3070_s14, %s3071_s17  }
  0x2d   : > { %s2968_s23 = scalar_lea.hbm %s3559_s5, 4096 }
  0x2e   : > { %p2969_p13 = scmp.ne.s32.totalorder %s3559_s5, %s2968_s23  ;;  %p2975_p9 = scmp.lt.u32.totalorder %s2968_s23, %s3559_s5 }
  0x30   : > { %p2971_p5 = pnand %p2969_p13, %p2942_p0 }
  0x32   : > { %p2972_p6 = pneg %p2971_p5 }
  0x34   : > { %p2977_p10 = pnand %p2975_p9, %p2972_p6 }
  0x36   : > { %2980 = shalt.err (!%p2977_p10)
}
  0x37   : > { %s2981_s15 = scalar_lea.vmem %s3177_s18, 4096  ;;  %p2989_p4 = scmp.lt.s32.totalorder %s3177_s18, %s3177_s18 }
  0x38   : > { %p2982_p1 = scmp.ne.s32.totalorder %s3177_s18, %s2981_s15  ;;  %p2990_p7 = scmp.lt.s32.totalorder %s2981_s15, %s2981_s15 }
  0x3a   : > { %p2984_p2 = pnand %p2982_p1, %p2942_p0  ;;  %p2991_p8 = por %p2990_p7, %p2989_p4 }
  0x3c   : > { %p2985_p3 = pneg %p2984_p2 }
  0x3e   : > { %p2992_p11 = pnand %p2991_p8, %p2985_p3 }
  0x40   : > { %2995 = shalt.err (!%p2992_p11)
}
  0x41   : > { %s3072_s10 = smov 64   ;;  %s3073_s14 = smov 4  }
  0x42   : > { %2673 = dma.hbm_to_vmem [thread:$0]  (!%p3173_p12), %s3559_s5, 4096, %s3177_s18, [#allocation6], %s3072_s10, %s3072_s10, %s3073_s14  }
  0x43   : > { %p3570_p13 = scmp.ne.s32.totalorder %s3568_s13, 0 }
  0x44   : > { %p3571_p0 = scmp.eq.s32.totalorder (!%p3570_p13), %s3137_s28, 0 }
  0x45   : > { %265 = sbr.rel (%p3570_p13) target bundleno = 1224 (0x4c8), region = 48 }
  0x4c   : > { %3041 = dma.done.wait (%p3571_p0), [#allocation3], 12288   ;;  %p3572_p5 = pmov %p3571_p0 }
  0x4d   : > { %p3573_p6 = pmov %p3571_p0 }
  0x4e   : > { %3043 = vsyncadd (%p3572_p5), [#allocation3], 4294955008 }
  0x4f   : > { %3045 = dma.done.wait (%p3573_p6), [#allocation6], 4096   ;;  %p3574_p9 = pmov %p3571_p0 }
  0x50   : > { %v3074_v0 = vmov 0   ;;  %v2722_v1 = vld [vmem:[#allocation2 + $0x4] ss:$48 sps:$4 sm:$0xff]   ;;  %v2724_v2 = vld [vmem:[#allocation2 + $0xc] ss:$48 sps:$4 sm:$0xff]   ;;  %p300_p12 = scmp.lt.s32.totalorder %s3137_s28, 1 }
  0x51   : > { %3047 = vsyncadd (%p3574_p9), [#allocation6], 4294963200  ;;  %978 = vmatprep.mubr.bf16.mxu0 %v3074_v0  ;;  %1019 = vmatprep.mubr.bf16.mxu1 %v3074_v0  ;;  %v2726_v3 = vld [vmem:[#allocation2] ss:$48 sps:$4 sm:$0xff]   ;;  %v2727_v4 = vld [vmem:[#allocation2 + $0x8] ss:$48 sps:$4 sm:$0xff]  }
  0x52   : > { %946 = vmatprep.subr.bf16.mxu0 %v2722_v1  ;;  %987 = vmatprep.subr.bf16.mxu1 %v2724_v2  ;;  %v2728_v5 = vld [vmem:[#allocation2 + $0x64] ss:$48 sps:$4 sm:$0xff]   ;;  %v2730_v6 = vld [vmem:[#allocation2 + $0x6c] ss:$48 sps:$4 sm:$0xff]   ;;  %v2732_v7 = vld [vmem:[#allocation2 + $0x60] ss:$48 sps:$4 sm:$0xff]  }
  0x53   : > { %947 = vmatpush1.bf16.msra.mxu0 %v2726_v3  ;;  %988 = vmatpush1.bf16.msra.mxu1 %v2727_v4  ;;  %v2733_v8 = vld [vmem:[#allocation2 + $0x68] ss:$48 sps:$4 sm:$0xff]   ;;  %v2734_v9 = vld [vmem:[#allocation2 + $0xc4] ss:$48 sps:$4 sm:$0xff]   ;;  %v2736_v10 = vld [vmem:[#allocation2 + $0xcc] ss:$48 sps:$4 sm:$0xff]  }
  0x54   : > { %948 = vmatprep.subr.bf16.mxu0 %v2728_v5  ;;  %989 = vmatprep.subr.bf16.mxu1 %v2730_v6  ;;  %v2738_v11 = vld [vmem:[#allocation2 + $0xc0] ss:$48 sps:$4 sm:$0xff]   ;;  %v2739_v12 = vld [vmem:[#allocation2 + $0xc8] ss:$48 sps:$4 sm:$0xff]   ;;  %v2740_v13 = vld [vmem:[#allocation2 + $0x124] ss:$48 sps:$4 sm:$0xff]  }
  0x55   : > { %v2742_v14 = vld [vmem:[#allocation2 + $0x12c] ss:$48 sps:$4 sm:$0xff]   ;;  %v2744_v15 = vld [vmem:[#allocation2 + $0x120] ss:$48 sps:$4 sm:$0xff]   ;;  %v2745_v16 = vld [vmem:[#allocation2 + $0x128] ss:$48 sps:$4 sm:$0xff]  }
  0x56   : > { %v2746_v17 = vld [vmem:[#allocation2 + $0x184] ss:$48 sps:$4 sm:$0xff]   ;;  %v2748_v18 = vld [vmem:[#allocation2 + $0x18c] ss:$48 sps:$4 sm:$0xff]   ;;  %v2750_v19 = vld [vmem:[#allocation2 + $0x180] ss:$48 sps:$4 sm:$0xff]  }
  0x57   : > { %949 = vmatpush1.bf16.msra.mxu0 %v2732_v7  ;;  %990 = vmatpush1.bf16.msra.mxu1 %v2733_v8  ;;  %v2751_v20 = vld [vmem:[#allocation2 + $0x188] ss:$48 sps:$4 sm:$0xff]   ;;  %v2752_v21 = vld [vmem:[#allocation2 + $0x1e4] ss:$48 sps:$4 sm:$0xff]   ;;  %v2754_v22 = vld [vmem:[#allocation2 + $0x1ec] ss:$48 sps:$4 sm:$0xff]  }
  0x58   : > { %950 = vmatprep.subr.bf16.mxu0 %v2734_v9  ;;  %991 = vmatprep.subr.bf16.mxu1 %v2736_v10  ;;  %v2756_v23 = vld [vmem:[#allocation2 + $0x1e0] ss:$48 sps:$4 sm:$0xff]   ;;  %v2757_v24 = vld [vmem:[#allocation2 + $0x1e8] ss:$48 sps:$4 sm:$0xff]   ;;  %s301_s13 = scalar_select %p300_p12, %s3137_s28, 1  ;;  %vm1536_vm0 = vcmask 523264  }
  0x59   : > { %v2758_v25 = vld [vmem:[#allocation2 + $0x244] ss:$48 sps:$4 sm:$0xff]   ;;  %v2760_v26 = vld [vmem:[#allocation2 + $0x24c] ss:$48 sps:$4 sm:$0xff]   ;;  %v2762_v27 = vld [vmem:[#allocation2 + $0x240] ss:$48 sps:$4 sm:$0xff]  }
  0x5a   : > { %v2763_v28 = vld [vmem:[#allocation2 + $0x248] ss:$48 sps:$4 sm:$0xff]   ;;  %s2367_s16 = sshll.u32 %s301_s13, 2  ;;  %v2764_v29 = vld [vmem:[#allocation2 + $0x2a4] ss:$48 sps:$4 sm:$0xff]   ;;  %s297_s18 = sand.u32 1, %s3058_s25  }
  0x5b   : > { %951 = vmatpush1.bf16.msra.mxu0 %v2738_v11  ;;  %992 = vmatpush1.bf16.msra.mxu1 %v2739_v12  ;;  %v2766_v30 = vld [vmem:[#allocation2 + $0x2ac] ss:$48 sps:$4 sm:$0xff]   ;;  %v2768_v31 = vld [vmem:[#allocation2 + $0x2a0] ss:$48 sps:$4 sm:$0xff]   ;;  %s303_s21 = scalar_lea.vmem %s3554_s0, %s2367_s16  ;;  %v2769_v32 = vld [vmem:[#allocation2 + $0x2a8] ss:$48 sps:$4 sm:$0xff]  }
  0x5c   : > { %952 = vmatprep.subr.bf16.mxu0 %v2740_v13  ;;  %993 = vmatprep.subr.bf16.mxu1 %v2742_v14  ;;  %v2772_v33 = vld [vmem:[#allocation2 + $0x14] ss:$48 sps:$4 sm:$0xff]   ;;  %v2775_v34 = vld [vmem:[#allocation2 + $0x1c] ss:$48 sps:$4 sm:$0xff]   ;;  %v3243_v35 = vld [vmem:[%s303_s21] sm:$0xf] }
  0x5d   : > { %v2770_v36 = vld [vmem:[#allocation2 + $0x10] ss:$48 sps:$4 sm:$0xff]   ;;  %v2773_v37 = vld [vmem:[#allocation2 + $0x18] ss:$48 sps:$4 sm:$0xff]   ;;  %v2778_v38 = vld [vmem:[#allocation2 + $0x74] ss:$48 sps:$4 sm:$0xff]  }
  0x5e   : > { %v2781_v39 = vld [vmem:[#allocation2 + $0x7c] ss:$48 sps:$4 sm:$0xff]   ;;  %v2776_v40 = vld [vmem:[#allocation2 + $0x70] ss:$48 sps:$4 sm:$0xff]   ;;  %v2779_v41 = vld [vmem:[#allocation2 + $0x78] ss:$48 sps:$4 sm:$0xff]  }
  0x5f   : > { %953 = vmatpush1.bf16.msra.mxu0 %v2744_v15  ;;  %994 = vmatpush1.bf16.msra.mxu1 %v2745_v16  ;;  %v2784_v42 = vld [vmem:[#allocation2 + $0xd4] ss:$48 sps:$4 sm:$0xff]   ;;  %v2787_v43 = vld [vmem:[#allocation2 + $0xdc] ss:$48 sps:$4 sm:$0xff]   ;;  %v2782_v44 = vld [vmem:[#allocation2 + $0xd0] ss:$48 sps:$4 sm:$0xff]  }
  0x60   : > { %954 = vmatprep.subr.bf16.mxu0 %v2746_v17  ;;  %995 = vmatprep.subr.bf16.mxu1 %v2748_v18  ;;  %v2785_v45 = vld [vmem:[#allocation2 + $0xd8] ss:$48 sps:$4 sm:$0xff]   ;;  %v2790_v46 = vld [vmem:[#allocation2 + $0x134] ss:$48 sps:$4 sm:$0xff]   ;;  %v2793_v47 = vld [vmem:[#allocation2 + $0x13c] ss:$48 sps:$4 sm:$0xff]  }
  0x61   : > { %v2788_v48 = vld [vmem:[#allocation2 + $0x130] ss:$48 sps:$4 sm:$0xff]   ;;  %v2791_v49 = vld [vmem:[#allocation2 + $0x138] ss:$48 sps:$4 sm:$0xff]   ;;  %v2796_v50 = vld [vmem:[#allocation2 + $0x194] ss:$48 sps:$4 sm:$0xff]  }
  0x62   : > { %v2799_v51 = vld [vmem:[#allocation2 + $0x19c] ss:$48 sps:$4 sm:$0xff]   ;;  %v2794_v52 = vld [vmem:[#allocation2 + $0x190] ss:$48 sps:$4 sm:$0xff]   ;;  %v2797_v53 = vld [vmem:[#allocation2 + $0x198] ss:$48 sps:$4 sm:$0xff]  }
  0x63   : > { %955 = vmatpush1.bf16.msra.mxu0 %v2750_v19  ;;  %996 = vmatpush1.bf16.msra.mxu1 %v2751_v20  ;;  %v2802_v54 = vld [vmem:[#allocation2 + $0x1f4] ss:$48 sps:$4 sm:$0xff]   ;;  %v2805_v55 = vld [vmem:[#allocation2 + $0x1fc] ss:$48 sps:$4 sm:$0xff]   ;;  %v2800_v56 = vld [vmem:[#allocation2 + $0x1f0] ss:$48 sps:$4 sm:$0xff]  }
  0x64   : > { %956 = vmatprep.subr.bf16.mxu0 %v2752_v21  ;;  %997 = vmatprep.subr.bf16.mxu1 %v2754_v22  ;;  %v2803_v57 = vld [vmem:[#allocation2 + $0x1f8] ss:$48 sps:$4 sm:$0xff]   ;;  %v2808_v58 = vld [vmem:[#allocation2 + $0x254] ss:$48 sps:$4 sm:$0xff]   ;;  %v2811_v59 = vld [vmem:[#allocation2 + $0x25c] ss:$48 sps:$4 sm:$0xff]  }
  0x65   : > { %v2806_v60 = vld [vmem:[#allocation2 + $0x250] ss:$48 sps:$4 sm:$0xff]   ;;  %v2809_v61 = vld [vmem:[#allocation2 + $0x258] ss:$48 sps:$4 sm:$0xff]   ;;  %v2814_v62 = vld [vmem:[#allocation2 + $0x2b4] ss:$48 sps:$4 sm:$0xff]  }
  0x66   : > { %v2817_v63 = vld [vmem:[#allocation2 + $0x2bc] ss:$48 sps:$4 sm:$0xff]   ;;  %v2812_v1 = vld [vmem:[#allocation2 + $0x2b0] ss:$48 sps:$4 sm:$0xff]   ;;  %v2815_v2 = vld [vmem:[#allocation2 + $0x2b8] ss:$48 sps:$4 sm:$0xff]  }
  0x67   : > { %957 = vmatpush1.bf16.msra.mxu0 %v2756_v23  ;;  %998 = vmatpush1.bf16.msra.mxu1 %v2757_v24  ;;  %v2820_v3 = vld [vmem:[#allocation2 + $0x24] ss:$48 sps:$4 sm:$0xff]   ;;  %v2823_v4 = vld [vmem:[#allocation2 + $0x2c] ss:$48 sps:$4 sm:$0xff]   ;;  %v2818_v5 = vld [vmem:[#allocation2 + $0x20] ss:$48 sps:$4 sm:$0xff]  }
  0x68   : > { %958 = vmatprep.subr.bf16.mxu0 %v2758_v25  ;;  %999 = vmatprep.subr.bf16.mxu1 %v2760_v26  ;;  %v2821_v6 = vld [vmem:[#allocation2 + $0x28] ss:$48 sps:$4 sm:$0xff]   ;;  %v2826_v7 = vld [vmem:[#allocation2 + $0x84] ss:$48 sps:$4 sm:$0xff]   ;;  %v2829_v8 = vld [vmem:[#allocation2 + $0x8c] ss:$48 sps:$4 sm:$0xff]  }
  0x69   : > { %v2824_v9 = vld [vmem:[#allocation2 + $0x80] ss:$48 sps:$4 sm:$0xff]   ;;  %v2827_v10 = vld [vmem:[#allocation2 + $0x88] ss:$48 sps:$4 sm:$0xff]   ;;  %v2832_v11 = vld [vmem:[#allocation2 + $0xe4] ss:$48 sps:$4 sm:$0xff]  }
  0x6a   : > { %v2835_v12 = vld [vmem:[#allocation2 + $0xec] ss:$48 sps:$4 sm:$0xff]   ;;  %v2830_v13 = vld [vmem:[#allocation2 + $0xe0] ss:$48 sps:$4 sm:$0xff]   ;;  %v2833_v14 = vld [vmem:[#allocation2 + $0xe8] ss:$48 sps:$4 sm:$0xff]  }
  0x6b   : > { %959 = vmatpush1.bf16.msra.mxu0 %v2762_v27  ;;  %1000 = vmatpush1.bf16.msra.mxu1 %v2763_v28  ;;  %v2838_v15 = vld [vmem:[#allocation2 + $0x144] ss:$48 sps:$4 sm:$0xff]   ;;  %v2841_v16 = vld [vmem:[#allocation2 + $0x14c] ss:$48 sps:$4 sm:$0xff]   ;;  %v2836_v17 = vld [vmem:[#allocation2 + $0x140] ss:$48 sps:$4 sm:$0xff]  }
  0x6c   : > { %960 = vmatprep.subr.bf16.mxu0 %v2764_v29  ;;  %1001 = vmatprep.subr.bf16.mxu1 %v2766_v30  ;;  %v2839_v18 = vld [vmem:[#allocation2 + $0x148] ss:$48 sps:$4 sm:$0xff]   ;;  %v2844_v19 = vld [vmem:[#allocation2 + $0x1a4] ss:$48 sps:$4 sm:$0xff]   ;;  %v2847_v20 = vld [vmem:[#allocation2 + $0x1ac] ss:$48 sps:$4 sm:$0xff]  }
  0x6d   : > { %v2842_v21 = vld [vmem:[#allocation2 + $0x1a0] ss:$48 sps:$4 sm:$0xff]   ;;  %v2845_v22 = vld [vmem:[#allocation2 + $0x1a8] ss:$48 sps:$4 sm:$0xff]   ;;  %v2850_v23 = vld [vmem:[#allocation2 + $0x204] ss:$48 sps:$4 sm:$0xff]  }
  0x6e   : > { %v2853_v24 = vld [vmem:[#allocation2 + $0x20c] ss:$48 sps:$4 sm:$0xff]   ;;  %v2848_v25 = vld [vmem:[#allocation2 + $0x200] ss:$48 sps:$4 sm:$0xff]   ;;  %v2851_v26 = vld [vmem:[#allocation2 + $0x208] ss:$48 sps:$4 sm:$0xff]  }
  0x6f   : > { %961 = vmatpush1.bf16.msra.mxu0 %v2768_v31  ;;  %1002 = vmatpush1.bf16.msra.mxu1 %v2769_v32  ;;  %v2856_v27 = vld [vmem:[#allocation2 + $0x264] ss:$48 sps:$4 sm:$0xff]   ;;  %v2859_v28 = vld [vmem:[#allocation2 + $0x26c] ss:$48 sps:$4 sm:$0xff]   ;;  %v2854_v29 = vld [vmem:[#allocation2 + $0x260] ss:$48 sps:$4 sm:$0xff]  }
  0x70   : > { %1028 = vmatprep.subr.bf16.mxu0 %v2772_v33  ;;  %1069 = vmatprep.subr.bf16.mxu1 %v2775_v34  ;;  %v2857_v30 = vld [vmem:[#allocation2 + $0x268] ss:$48 sps:$4 sm:$0xff]   ;;  %v2862_v31 = vld [vmem:[#allocation2 + $0x2c4] ss:$48 sps:$4 sm:$0xff]   ;;  %v2865_v32 = vld [vmem:[#allocation2 + $0x2cc] ss:$48 sps:$4 sm:$0xff]  }
  0x71   : > { %v2860_v33 = vld [vmem:[#allocation2 + $0x2c0] ss:$48 sps:$4 sm:$0xff]   ;;  %v2863_v34 = vld [vmem:[#allocation2 + $0x2c8] ss:$48 sps:$4 sm:$0xff]   ;;  %s2366_s20 = sshll.u32 %s297_s18, 3  ;;  %s2566_s23 = sshll.u32 %s3137_s28, 7 }
  0x72   : > { %979 = vmatmul.mubr.bf16.vlgmr.msra.gmra.mrb[0].mxu0 %v3243_v35  ;;  %1020 = vmatmul.mubr.bf16.vlgmr.msra.gmra.mrb[0].mxu1 %v3243_v35  ;;  %s299_s29 = scalar_lea.vmem [#allocation7], %s2366_s20  ;;  %s3512_s10 = scalar_lea.hbm %s3561_s7, %s2566_s23 }
  0x73   : > { %1029 = vmatpush1.bf16.msra.mxu0 %v2770_v36  ;;  %1070 = vmatpush1.bf16.msra.mxu1 %v2773_v37  ;;  %v2866_v36 = vld [vmem:[%s3557_s3 + $0x40] sm:$0xff]   ;;  %s2277_s8 = sshll.u32 %s299_s29, 4  ;;  %s2264_s14 = scalar_lea.sflag [#allocation4], %s297_s18  ;;  %s3514_s8 = int_to_ptr.vmem [resolvable:$true] %s2277_s8 }
  0x74   : > { %1030 = vmatprep.subr.bf16.mxu0 %v2778_v38  ;;  %1071 = vmatprep.subr.bf16.mxu1 %v2781_v39  ;;  %v2867_v37 = vld [vmem:[%s3557_s3 + $0xc0] sm:$0xff]   ;;  %s2996_s17 = scalar_lea.vmem %s3514_s8, 128  ;;  %p3575_p1 = scmp.ne.s32.totalorder %s3566_s11, 0 }
  0x75   : > { %1060 = vmatprep.mubr.bf16.mxu0 %v3074_v0  ;;  %1101 = vmatprep.mubr.bf16.mxu1 %v3074_v0  ;;  %v2868_v38 = vld [vmem:[%s3557_s3] sm:$0xff]   ;;  %p2997_p10 = scmp.ne.s32.totalorder %s3514_s8, %s2996_s17  ;;  %s3075_s28 = smov [#allocation7]  }
  0x76   : > { %v2869_v39 = vld [vmem:[%s3557_s3 + $0x80] sm:$0xff]   ;;  %s3000_s19 = sshll.u32 %s3075_s28, 4  ;;  %s3001_s19 = int_to_ptr.vmem [resolvable:$false] %s3000_s19 }
  0x77   : > { %1031 = vmatpush1.bf16.msra.mxu0 %v2776_v40  ;;  %1072 = vmatpush1.bf16.msra.mxu1 %v2779_v41  ;;  %v2870_v40 = vld [vmem:[%s3557_s3 + $0x48] sm:$0xff]   ;;  %p2998_p2 = pnand %p2997_p10, %p3575_p1  ;;  %s3002_s13 = scalar_lea.vmem %s3001_s19, 256 }
  0x78   : > { %1032 = vmatprep.subr.bf16.mxu0 %v2784_v42  ;;  %1073 = vmatprep.subr.bf16.mxu1 %v2787_v43  ;;  %v2871_v41 = vld [vmem:[%s3557_s3 + $0xc8] sm:$0xff]   ;;  %p3003_p4 = scmp.lt.s32.totalorder %s3514_s8, %s3001_s19  ;;  %p3004_p7 = scmp.lt.s32.totalorder %s3002_s13, %s2996_s17 }
  0x79   : > { %v2872_v42 = vld [vmem:[%s3557_s3 + $0x8] sm:$0xff]   ;;  %p2999_p3 = pneg %p2998_p2 }
  0x7a   : > { %v2873_v43 = vld [vmem:[%s3557_s3 + $0x88] sm:$0xff]   ;;  %p3005_p8 = por %p3004_p7, %p3003_p4 }
  0x7b   : > { %1033 = vmatpush1.bf16.msra.mxu0 %v2782_v44  ;;  %1074 = vmatpush1.bf16.msra.mxu1 %v2785_v45  ;;  %v2874_v44 = vld [vmem:[%s3557_s3 + $0x50] sm:$0xff]  }
  0x7c   : > { %1034 = vmatprep.subr.bf16.mxu0 %v2790_v46  ;;  %1075 = vmatprep.subr.bf16.mxu1 %v2793_v47  ;;  %v2876_v45 = vld [vmem:[%s3557_s3 + $0x10] sm:$0xff]   ;;  %v2878_v47 = vld [vmem:[%s3557_s3 + $0x58] sm:$0xff]   ;;  %p3006_p11 = pnand %p3005_p8, %p2999_p3 }
  0x7d   : > { %v2877_v46 = vld [vmem:[%s3557_s3 + $0x90] sm:$0xff]  }
  0x7f   : > { %1035 = vmatpush1.bf16.msra.mxu0 %v2788_v48  ;;  %1076 = vmatpush1.bf16.msra.mxu1 %v2791_v49  ;;  %v2879_v48 = vld [vmem:[%s3557_s3 + $0xd8] sm:$0xff]  }
  0x80   : > { %1036 = vmatprep.subr.bf16.mxu0 %v2796_v50  ;;  %1077 = vmatprep.subr.bf16.mxu1 %v2799_v51  ;;  %v2880_v49 = vld [vmem:[%s3557_s3 + $0x18] sm:$0xff]   ;;  %v2882_v51 = vld [vmem:[%s3557_s3 + $0x60] sm:$0xff]  }
  0x81   : > { %v2881_v50 = vld [vmem:[%s3557_s3 + $0x98] sm:$0xff]  }
  0x83   : > { %1037 = vmatpush1.bf16.msra.mxu0 %v2794_v52  ;;  %1078 = vmatpush1.bf16.msra.mxu1 %v2797_v53  ;;  %v2883_v52 = vld [vmem:[%s3557_s3 + $0xe0] sm:$0xff]  }
  0x84   : > { %1038 = vmatprep.subr.bf16.mxu0 %v2802_v54  ;;  %1079 = vmatprep.subr.bf16.mxu1 %v2805_v55  ;;  %v2884_v53 = vld [vmem:[%s3557_s3 + $0x20] sm:$0xff]   ;;  %v2886_v55 = vld [vmem:[%s3557_s3 + $0x68] sm:$0xff]  }
  0x85   : > { %v2885_v54 = vld [vmem:[%s3557_s3 + $0xa0] sm:$0xff]  }
  0x87   : > { %1039 = vmatpush1.bf16.msra.mxu0 %v2800_v56  ;;  %1080 = vmatpush1.bf16.msra.mxu1 %v2803_v57  ;;  %v2887_v56 = vld [vmem:[%s3557_s3 + $0xe8] sm:$0xff]  }
  0x88   : > { %1040 = vmatprep.subr.bf16.mxu0 %v2808_v58  ;;  %1081 = vmatprep.subr.bf16.mxu1 %v2811_v59  ;;  %v2888_v57 = vld [vmem:[%s3557_s3 + $0x28] sm:$0xff]   ;;  %v2890_v59 = vld [vmem:[%s3557_s3 + $0x70] sm:$0xff]  }
  0x89   : > { %v2889_v58 = vld [vmem:[%s3557_s3 + $0xa8] sm:$0xff]  }
  0x8b   : > { %1041 = vmatpush1.bf16.msra.mxu0 %v2806_v60  ;;  %1082 = vmatpush1.bf16.msra.mxu1 %v2809_v61  ;;  %v2891_v60 = vld [vmem:[%s3557_s3 + $0xf0] sm:$0xff]  }
  0x8c   : > { %1042 = vmatprep.subr.bf16.mxu0 %v2814_v62  ;;  %1083 = vmatprep.subr.bf16.mxu1 %v2817_v63  ;;  %v2892_v61 = vld [vmem:[%s3557_s3 + $0x30] sm:$0xff]   ;;  %v2894_v63 = vld [vmem:[%s3557_s3 + $0x78] sm:$0xff]  }
  0x8d   : > { %v2893_v62 = vld [vmem:[%s3557_s3 + $0xb0] sm:$0xff]  }
  0x8f   : > { %1043 = vmatpush1.bf16.msra.mxu0 %v2812_v1  ;;  %1084 = vmatpush1.bf16.msra.mxu1 %v2815_v2  ;;  %v2895_v1 = vld [vmem:[%s3557_s3 + $0xf8] sm:$0xff]  }
  0x90   : > { %1110 = vmatprep.subr.bf16.mxu0 %v2820_v3  ;;  %1151 = vmatprep.subr.bf16.mxu1 %v2823_v4  ;;  %v2896_v2 = vld [vmem:[%s3557_s3 + $0x38] sm:$0xff]  }
  0x91   : > { %v2897_v3 = vld [vmem:[%s3557_s3 + $0xb8] sm:$0xff]  }
  0x92   : > { %1061 = vmatmul.mubr.bf16.vlgmr.msra.gmra.mrb[4].mxu0 %v3243_v35  ;;  %1102 = vmatmul.mubr.bf16.vlgmr.msra.gmra.mrb[4].mxu1 %v3243_v35 }
  0x93   : > { %1111 = vmatpush1.bf16.msra.mxu0 %v2818_v5  ;;  %1152 = vmatpush1.bf16.msra.mxu1 %v2821_v6 }
  0x94   : > { %1112 = vmatprep.subr.bf16.mxu0 %v2826_v7  ;;  %1153 = vmatprep.subr.bf16.mxu1 %v2829_v8 }
  0x95   : > { %1142 = vmatprep.mubr.bf16.mxu0 %v3074_v0  ;;  %1183 = vmatprep.mubr.bf16.mxu1 %v3074_v0 }
  0x97   : > { %1113 = vmatpush1.bf16.msra.mxu0 %v2824_v9  ;;  %1154 = vmatpush1.bf16.msra.mxu1 %v2827_v10 }
  0x98   : > { %1114 = vmatprep.subr.bf16.mxu0 %v2832_v11  ;;  %1155 = vmatprep.subr.bf16.mxu1 %v2835_v12  ;;  %v406_v12 = vlaneseq }
  0x9b   : > { %1115 = vmatpush1.bf16.msra.mxu0 %v2830_v13  ;;  %1156 = vmatpush1.bf16.msra.mxu1 %v2833_v14  ;;  %v3351_v13 = vshrl.u32 %v406_v12, 7  ;;  %v1544_v12 = vld [vmem:[%s3558_s4] sm:$0xff] }
  0x9c   : > { %1116 = vmatprep.subr.bf16.mxu0 %v2838_v15  ;;  %1157 = vmatprep.subr.bf16.mxu1 %v2841_v16 }
  0x9d   : > { %v408_v14 = vsub.s32 0, %v3351_v13  ;;  %v416_v15 = vsub.s32 2, %v3351_v13  ;;  %v424_v16 = vsub.s32 4, %v3351_v13 }
  0x9f   : > { %1117 = vmatpush1.bf16.msra.mxu0 %v2836_v17  ;;  %1158 = vmatpush1.bf16.msra.mxu1 %v2839_v18  ;;  %v432_v17 = vsub.s32 6, %v3351_v13  ;;  %v402_v18 = vld [vmem:[%s3556_s2] sm:$0xff] }
  0xa0   : > { %1118 = vmatprep.subr.bf16.mxu0 %v2844_v19  ;;  %1159 = vmatprep.subr.bf16.mxu1 %v2847_v20  ;;  %v412_v19 = vsub.s32 1, %v3351_v13  ;;  %v420_v20 = vsub.s32 3, %v3351_v13 }
  0xa3   : > { %1119 = vmatpush1.bf16.msra.mxu0 %v2842_v21  ;;  %1160 = vmatpush1.bf16.msra.mxu1 %v2845_v22  ;;  %v428_v21 = vsub.s32 5, %v3351_v13  ;;  %v436_v22 = vsub.s32 7, %v3351_v13 }
  0xa4   : > { %1120 = vmatprep.subr.bf16.mxu0 %v2850_v23  ;;  %1161 = vmatprep.subr.bf16.mxu1 %v2853_v24  ;;  %v409_v23 = vrot.slane %v402_v18, %v408_v14  ;;  %v417_v24 = vrot.slane %v402_v18, %v416_v15 }
  0xa7   : > { %1121 = vmatpush1.bf16.msra.mxu0 %v2848_v25  ;;  %1162 = vmatpush1.bf16.msra.mxu1 %v2851_v26  ;;  %v425_v25 = vrot.slane %v402_v18, %v424_v16  ;;  %v433_v26 = vrot.slane %v402_v18, %v432_v17  ;;  %v1548_v16 = vld [vmem:[%s3558_s4 + $0x20] sm:$0xff]  ;;  %v1545_v17 = vld [vmem:[%s3558_s4 + $0x8] sm:$0xff] }
  0xa8   : > { %1122 = vmatprep.subr.bf16.mxu0 %v2856_v27  ;;  %1163 = vmatprep.subr.bf16.mxu1 %v2859_v28  ;;  %v413_v27 = vrot.slane %v402_v18, %v412_v19  ;;  %v421_v28 = vrot.slane %v402_v18, %v420_v20 }
  0xab   : > { %1123 = vmatpush1.bf16.msra.mxu0 %v2854_v29  ;;  %1164 = vmatpush1.bf16.msra.mxu1 %v2857_v30  ;;  %v429_v29 = vrot.slane %v402_v18, %v428_v21  ;;  %v437_v30 = vrot.slane %v402_v18, %v436_v22  ;;  %v2497_v18 = vcombine.high %v1544_v12, %v1548_v16  ;;  %v1549_v21 = vld [vmem:[%s3558_s4 + $0x28] sm:$0xff] }
  0xac   : > { %1124 = vmatprep.subr.bf16.mxu0 %v2862_v31  ;;  %1165 = vmatprep.subr.bf16.mxu1 %v2865_v32  ;;  %v2496_v22 = vcombine.low %v1544_v12, %v1548_v16  ;;  %v1567_v12 = vld [vmem:[%s3558_s4 + $0xb8] sm:$0xff] }
  0xaf   : > { %1125 = vmatpush1.bf16.msra.mxu0 %v2860_v33  ;;  %1166 = vmatpush1.bf16.msra.mxu1 %v2863_v34 }
  0xb0   : > { %2569 = vmatprep.subr.bf16.mxu0 %v2866_v36  ;;  %2591 = vmatprep.subr.bf16.mxu1 %v2867_v37 }
  0xb2   : > { %1143 = vmatmul.mubr.bf16.vlgmr.msra.gmra.mrb[8].mxu0 %v3243_v35  ;;  %1184 = vmatmul.mubr.bf16.vlgmr.msra.gmra.mrb[8].mxu1 %v3243_v35  ;;  %v2875_v35 = vld [vmem:[%s3557_s3 + $0xd0] sm:$0xff]  }
  0xb3   : > { %2570 = vmatpush3.bf16.msra.mxu0 %v2868_v38  ;;  %2592 = vmatpush3.bf16.msra.mxu1 %v2869_v39 }
  0xb4   : > { %2571 = vmatprep.subr.bf16.mxu0 %v2870_v40  ;;  %2593 = vmatprep.subr.bf16.mxu1 %v2871_v41 }
  0xb7   : > { %2572 = vmatpush3.bf16.msra.mxu0 %v2872_v42  ;;  %2594 = vmatpush3.bf16.msra.mxu1 %v2873_v43 }
  0xb8   : > { %2573 = vmatprep.subr.bf16.mxu0 %v2874_v44  ;;  %2595 = vmatprep.subr.bf16.mxu1 %v2875_v35 }
  0xbb   : > { %2574 = vmatpush3.bf16.msra.mxu0 %v2876_v45  ;;  %2596 = vmatpush3.bf16.msra.mxu1 %v2877_v46 }
  0xbc   : > { %2575 = vmatprep.subr.bf16.mxu0 %v2878_v47  ;;  %2597 = vmatprep.subr.bf16.mxu1 %v2879_v48 }
  0xbf   : > { %2576 = vmatpush3.bf16.msra.mxu0 %v2880_v49  ;;  %2598 = vmatpush3.bf16.msra.mxu1 %v2881_v50 }
  0xc0   : > { %2577 = vmatprep.subr.bf16.mxu0 %v2882_v51  ;;  %2599 = vmatprep.subr.bf16.mxu1 %v2883_v52 }
  0xc3   : > { %2578 = vmatpush3.bf16.msra.mxu0 %v2884_v53  ;;  %2600 = vmatpush3.bf16.msra.mxu1 %v2885_v54 }
  0xc4   : > { %2579 = vmatprep.subr.bf16.mxu0 %v2886_v55  ;;  %2601 = vmatprep.subr.bf16.mxu1 %v2887_v56 }
  0xc7   : > { %2580 = vmatpush3.bf16.msra.mxu0 %v2888_v57  ;;  %2602 = vmatpush3.bf16.msra.mxu1 %v2889_v58 }
  0xc8   : > { %2581 = vmatprep.subr.bf16.mxu0 %v2890_v59  ;;  %2603 = vmatprep.subr.bf16.mxu1 %v2891_v60 }
  0xcb   : > { %2582 = vmatpush3.bf16.msra.mxu0 %v2892_v61  ;;  %2604 = vmatpush3.bf16.msra.mxu1 %v2893_v62 }
  0xcc   : > { %2583 = vmatprep.subr.bf16.mxu0 %v2894_v63  ;;  %2605 = vmatprep.subr.bf16.mxu1 %v2895_v1 }
  0xcf   : > { %2584 = vmatpush3.bf16.msra.mxu0 %v2896_v2  ;;  %2606 = vmatpush3.bf16.msra.mxu1 %v2897_v3 }
  0xd0   : > { %1739 = vmatprep.subr.bf16.mxu0 %v2497_v18 }
 0x145   : > { %v980_v4 = vpop.f32.mrb[0].mxu0  ;;  %v1021_v5 = vpop.f32.mrb[0].mxu1 }
 0x146   : > { %v982_v6 = vpop.f32.mrb[1].mxu0  ;;  %v1023_v7 = vpop.f32.mrb[1].mxu1  ;;  %v981_v33 = vadd.f32 %v980_v4, %v409_v23  ;;  %v1022_v34 = vadd.f32 %v1021_v5, %v417_v24  ;;  %v2498_v23 = vcombine.low %v1545_v17, %v1549_v21  ;;  %v2499_v24 = vcombine.high %v1545_v17, %v1549_v21 }
 0x147   : > { %v984_v8 = vpop.f32.mrb[2].mxu0  ;;  %v1025_v9 = vpop.f32.mrb[2].mxu1  ;;  %v983_v40 = vadd.f32 %v982_v6, %v413_v27  ;;  %v1024_v41 = vadd.f32 %v1023_v7, %v421_v28  ;;  %v1553_v27 = vld [vmem:[%s3558_s4 + $0x48] sm:$0xff] }
 0x148   : > { %v985_v10 = vpop.f32.mrb[3].mxu0  ;;  %v1026_v11 = vpop.f32.mrb[3].mxu1  ;;  %1780 = vmatprep.subr.bf16.mxu1 %v2499_v24  ;;  %v1571_v24 = vld [vmem:[%s3558_s4 + $0xd8] sm:$0xff] }
 0x165   : > { %v1062_v31 = vpop.f32.mrb[4].mxu0  ;;  %v1103_v32 = vpop.f32.mrb[4].mxu1 }
 0x166   : > { %v1063_v36 = vadd.f32 %v1062_v31, %v425_v25  ;;  %v1104_v37 = vadd.f32 %v1103_v32, %v433_v26  ;;  %v1064_v38 = vpop.f32.mrb[5].mxu0  ;;  %v1105_v39 = vpop.f32.mrb[5].mxu1  ;;  %v1552_v25 = vld [vmem:[%s3558_s4 + $0x40] sm:$0xff] }
 0x167   : > { %v1065_v42 = vadd.f32 %v1064_v38, %v429_v29  ;;  %v1106_v43 = vadd.f32 %v1105_v39, %v437_v30  ;;  %v1066_v44 = vpop.f32.mrb[6].mxu0  ;;  %v1107_v35 = vpop.f32.mrb[6].mxu1  ;;  %v1556_v26 = vld [vmem:[%s3558_s4 + $0x60] sm:$0xff]  ;;  %v1557_v29 = vld [vmem:[%s3558_s4 + $0x68] sm:$0xff] }
 0x168   : > { %v1192_v45 = vmul.f32 %v1063_v36, %v981_v33  ;;  %v1194_v46 = vmul.f32 %v1104_v37, %v1022_v34  ;;  %v1067_v47 = vpop.f32.mrb[7].mxu0  ;;  %v1108_v48 = vpop.f32.mrb[7].mxu1  ;;  %v2505_v28 = vcombine.high %v1552_v25, %v1556_v26  ;;  %v2504_v30 = vcombine.low %v1552_v25, %v1556_v26  ;;  %v1560_v33 = vld [vmem:[%s3558_s4 + $0x80] sm:$0xff]  ;;  %v1561_v36 = vld [vmem:[%s3558_s4 + $0x88] sm:$0xff]  ;;  %v1575_v25 = vld [vmem:[%s3558_s4 + $0xf8] sm:$0xff] }
 0x169   : > { %v1193_v49 = vmul.f32 %v1065_v42, %v983_v40  ;;  %v1195_v50 = vmul.f32 %v1106_v43, %v1024_v41  ;;  %v2506_v31 = vcombine.low %v1553_v27, %v1557_v29  ;;  %v2507_v32 = vcombine.high %v1553_v27, %v1557_v29  ;;  %v1564_v34 = vld [vmem:[%s3558_s4 + $0xa0] sm:$0xff]  ;;  %v1565_v38 = vld [vmem:[%s3558_s4 + $0xa8] sm:$0xff] }
 0x16a   : > { %v1196_v53 = vpack.c.bf16 %v1192_v45, %v1192_v45  ;;  %v1198_v54 = vpack.c.bf16 %v1194_v46, %v1194_v46  ;;  %v2513_v37 = vcombine.high %v1560_v33, %v1564_v34  ;;  %v2512_v39 = vcombine.low %v1560_v33, %v1564_v34  ;;  %v1568_v42 = vld [vmem:[%s3558_s4 + $0xc0] sm:$0xff]  ;;  %v1569_v44 = vld [vmem:[%s3558_s4 + $0xc8] sm:$0xff] }
 0x16b   : > { %v1197_v51 = vpack.c.bf16 %v1193_v49, %v1193_v49  ;;  %v1199_v52 = vpack.c.bf16 %v1195_v50, %v1195_v50  ;;  %v2514_v40 = vcombine.low %v1561_v36, %v1565_v38  ;;  %v2515_v41 = vcombine.high %v1561_v36, %v1565_v38  ;;  %v1572_v43 = vld [vmem:[%s3558_s4 + $0xe0] sm:$0xff]  ;;  %v1573_v45 = vld [vmem:[%s3558_s4 + $0xe8] sm:$0xff]  ;;  %v1546_v49 = vld [vmem:[%s3558_s4 + $0x10] sm:$0xff] }
 0x16c   : > { %v2521_v35 = vcombine.high %v1568_v42, %v1572_v43  ;;  %v2520_v46 = vcombine.low %v1568_v42, %v1572_v43  ;;  %v2522_v47 = vcombine.low %v1569_v44, %v1573_v45  ;;  %v2523_v48 = vcombine.high %v1569_v44, %v1573_v45  ;;  %v1550_v50 = vld [vmem:[%s3558_s4 + $0x30] sm:$0xff]  ;;  %v2900_v33 = vld [vmem:[#allocation5] sm:$0xff]   ;;  %v2902_v36 = vld [vmem:[#allocation5 + $0x48] sm:$0xff]  }
 0x16d   : > { %1488 = vmatprep.mubr.bf16.mxu0 %v1197_v51  ;;  %1528 = vmatprep.mubr.bf16.mxu1 %v1199_v52  ;;  %v1547_v51 = vld [vmem:[%s3558_s4 + $0x18] sm:$0xff]  ;;  %v2501_v52 = vcombine.high %v1546_v49, %v1550_v50  ;;  %v2527_v29 = vcombine.high %v1571_v24, %v1575_v25  ;;  %v2901_v34 = vld [vmem:[#allocation5 + $0x80] sm:$0xff]   ;;  %v2904_v38 = vld [vmem:[#allocation5 + $0x8] sm:$0xff]  }
 0x16e   : > { %1489 = vmatmul.mubr.bf16.vlgmr.msra.gmra.mrb[12].mxu0 %v1196_v53  ;;  %1529 = vmatmul.mubr.bf16.vlgmr.msra.gmra.mrb[12].mxu1 %v1198_v54  ;;  %v1551_v53 = vld [vmem:[%s3558_s4 + $0x38] sm:$0xff]  ;;  %v2500_v54 = vcombine.low %v1546_v49, %v1550_v50  ;;  %v2908_v42 = vld [vmem:[#allocation5 + $0x10] sm:$0xff]   ;;  %v2916_v49 = vld [vmem:[#allocation5 + $0x20] sm:$0xff]  }
 0x16f   : > { %1771 = vmatprep.mubr.bf16.mxu0 %v3074_v0  ;;  %1812 = vmatprep.mubr.bf16.mxu1 %v3074_v0  ;;  %v2909_v43 = vld [vmem:[#allocation5 + $0x90] sm:$0xff]   ;;  %v2910_v44 = vld [vmem:[#allocation5 + $0x58] sm:$0xff]   ;;  %v2917_v50 = vld [vmem:[#allocation5 + $0xa0] sm:$0xff]  }
 0x170   : > { %1740 = vmatpush1.bf16.msra.mxu0 %v2496_v22  ;;  %1781 = vmatpush1.bf16.msra.mxu1 %v2498_v23  ;;  %v1570_v22 = vld [vmem:[%s3558_s4 + $0xd0] sm:$0xff]  ;;  %v2912_v45 = vld [vmem:[#allocation5 + $0x18] sm:$0xff]  }
 0x171   : > { %1741 = vmatprep.subr.bf16.mxu0 %v2505_v28  ;;  %1782 = vmatprep.subr.bf16.mxu1 %v2507_v32  ;;  %v1574_v23 = vld [vmem:[%s3558_s4 + $0xf0] sm:$0xff]  ;;  %v2899_v32 = vld [vmem:[#allocation5 + $0xc0] sm:$0xff]  }
 0x172   : > { %v2525_v28 = vcombine.high %v1570_v22, %v1574_v23 }
 0x174   : > { %1742 = vmatpush1.bf16.msra.mxu0 %v2504_v30  ;;  %1783 = vmatpush1.bf16.msra.mxu1 %v2506_v31  ;;  %v2524_v30 = vcombine.low %v1570_v22, %v1574_v23  ;;  %v2526_v31 = vcombine.low %v1571_v24, %v1575_v25  ;;  %v403_v25 = vld [vmem:[%s3556_s2 + $0x8] sm:$0xf] }
 0x175   : > { %1743 = vmatprep.subr.bf16.mxu0 %v2513_v37  ;;  %1784 = vmatprep.subr.bf16.mxu1 %v2515_v41  ;;  %v2903_v37 = vld [vmem:[#allocation5 + $0xc8] sm:$0xff]   ;;  %v2907_v41 = vld [vmem:[#allocation5 + $0xd0] sm:$0xff]  }
 0x178   : > { %1744 = vmatpush1.bf16.msra.mxu0 %v2512_v39  ;;  %1785 = vmatpush1.bf16.msra.mxu1 %v2514_v40  ;;  %v2905_v39 = vld [vmem:[#allocation5 + $0x88] sm:$0xff]   ;;  %v2906_v40 = vld [vmem:[#allocation5 + $0x50] sm:$0xff]  }
 0x179   : > { %1745 = vmatprep.subr.bf16.mxu0 %v2521_v35  ;;  %1786 = vmatprep.subr.bf16.mxu1 %v2523_v48  ;;  %v2911_v35 = vld [vmem:[#allocation5 + $0xd8] sm:$0xff]   ;;  %v2915_v48 = vld [vmem:[#allocation5 + $0xe0] sm:$0xff]  }
 0x17c   : > { %1746 = vmatpush1.bf16.msra.mxu0 %v2520_v46  ;;  %1787 = vmatpush1.bf16.msra.mxu1 %v2522_v47  ;;  %v2913_v46 = vld [vmem:[#allocation5 + $0x98] sm:$0xff]   ;;  %v2914_v47 = vld [vmem:[#allocation5 + $0x60] sm:$0xff]  }
 0x17d   : > { %1821 = vmatprep.subr.bf16.mxu0 %v2501_v52  ;;  %v2919_v52 = vld [vmem:[#allocation5 + $0xe8] sm:$0xff]  }
 0x185   : > { %v3374_v55 = vpop.f32.mrb[8].mxu0  ;;  %v3376_v56 = vpop.f32.mrb[8].mxu1 }
 0x186   : > { %v3378_v57 = vpop.f32.mrb[9].mxu0  ;;  %v3380_v58 = vpop.f32.mrb[9].mxu1 }
 0x187   : > { %v1148_v59 = vpop.f32.mrb[10].mxu0  ;;  %v1189_v60 = vpop.f32.mrb[10].mxu1 }
 0x188   : > { %v1149_v61 = vpop.f32.mrb[11].mxu0  ;;  %v1190_v62 = vpop.f32.mrb[11].mxu1  ;;  %v2502_v59 = vcombine.low %v1547_v51, %v1551_v53  ;;  %v2503_v60 = vcombine.high %v1547_v51, %v1551_v53  ;;  %v2918_v51 = vld [vmem:[#allocation5 + $0x68] sm:$0xff]  }
 0x189   : > { %v2920_v53 = vld [vmem:[#allocation5 + $0x28] sm:$0xff]  }
 0x18a   : > { %1862 = vmatprep.subr.bf16.mxu1 %v2503_v60  ;;  %v2923_v60 = vld [vmem:[#allocation5 + $0xf0] sm:$0xff]  }
 0x241   : > { %v2585_v63 = vpop.f32.mrb[12].mxu0  ;;  %v2607_v1 = vpop.f32.mrb[12].mxu1 }
 0x242   : > { %v2586_v2 = vpop.f32.mrb[13].mxu0  ;;  %v2608_v3 = vpop.f32.mrb[13].mxu1 }
 0x243   : > { %v2587_v4 = vadd.f32 %v2586_v2, %v2585_v63  ;;  %v2609_v5 = vadd.f32 %v2608_v3, %v2607_v1  ;;  %v2588_v6 = vpop.f32.mrb[14].mxu0  ;;  %v2610_v7 = vpop.f32.mrb[14].mxu1  ;;  %v1554_v1 = vld [vmem:[%s3558_s4 + $0x50] sm:$0xff]  ;;  %v1555_v3 = vld [vmem:[%s3558_s4 + $0x58] sm:$0xff] }
 0x244   : > { %v2589_v8 = vpop.f32.mrb[15].mxu0  ;;  %v2611_v9 = vpop.f32.mrb[15].mxu1  ;;  %v1558_v2 = vld [vmem:[%s3558_s4 + $0x70] sm:$0xff] }
 0x245   : > { %v3382_v10 = vadd.f32 %v2609_v5, %v2587_v4  ;;  %v1559_v4 = vld [vmem:[%s3558_s4 + $0x78] sm:$0xff]  ;;  %v2509_v7 = vcombine.high %v1554_v1, %v1558_v2  ;;  %v1562_v9 = vld [vmem:[%s3558_s4 + $0x90] sm:$0xff]  ;;  %v2508_v16 = vcombine.low %v1554_v1, %v1558_v2 }
 0x246   : > { %v2511_v8 = vcombine.high %v1555_v3, %v1559_v4  ;;  %v2510_v17 = vcombine.low %v1555_v3, %v1559_v4  ;;  %v2927_v1 = vld [vmem:[#allocation5 + $0xf8] sm:$0xff]  }
 0x247   : > { %v1537_v11 = vsel %vm1536_vm0, %v3382_v10, -inf  ;;  %v2928_v2 = vld [vmem:[#allocation5 + $0x38] sm:$0xff]  }
 0x248   : > { %1538 = vmax.xlane.f32.xlu0 %v1537_v11  ;;  %v1563_v11 = vld [vmem:[%s3558_s4 + $0x98] sm:$0xff] }
 0x249   : > { %v2519_v21 = vcombine.high %v1563_v11, %v1567_v12  ;;  %v2518_v27 = vcombine.low %v1563_v11, %v1567_v12  ;;  %v2929_v3 = vld [vmem:[#allocation5 + $0xb8] sm:$0xff]  }
 0x2d5   : > { %v1539_v61 = vpop.xlane.xlu0 %1538 }
 0x2d6   : > { %v1540_v62 = vsub.f32 %v3382_v10, %v1539_v61  ;;  %v1566_v10 = vld [vmem:[%s3558_s4 + $0xb0] sm:$0xff] }
 0x2d7   : > { %v2517_v18 = vcombine.high %v1562_v9, %v1566_v10  ;;  %v2516_v26 = vcombine.low %v1562_v9, %v1566_v10  ;;  %v2924_v61 = vld [vmem:[#allocation5 + $0x30] sm:$0xff]  }
 0x2d8   : > { %v1541_v63 = vmul.f32 1.442695, %v1540_v62  ;;  %v2925_v62 = vld [vmem:[#allocation5 + $0xb0] sm:$0xff]  }
 0x2da   : > { %2930 = vpow2.f32 %v1541_v63  ;;  %v2926_v63 = vld [vmem:[#allocation5 + $0x78] sm:$0xff]  }
 0x2e4   : > { %v2931_v5 = vpop.eup %2930 }
 0x2e5   : > { %v1543_v6 = vpack.c.bf16 %v2931_v5, %v2931_v5 }
 0x2e7   : > { %2528 = vmatmul.mubr.msk.bf16.vlgmr.msra.gmra.mrb[16].mxu0 %vm1536_vm0, %v1543_v6  ;;  %2529 = vmatmul.mubr.msk.bf16.vlgmr.msra.gmra.mrb[16].mxu1 %vm1536_vm0, %v1543_v6 }
 0x2e8   : > { %1822 = vmatpush1.bf16.msra.mxu0 %v2500_v54  ;;  %1863 = vmatpush1.bf16.msra.mxu1 %v2502_v59  ;;  %v2921_v54 = vld [vmem:[#allocation5 + $0xa8] sm:$0xff]   ;;  %v2922_v59 = vld [vmem:[#allocation5 + $0x70] sm:$0xff]  }
 0x2e9   : > { %1823 = vmatprep.subr.bf16.mxu0 %v2509_v7  ;;  %1864 = vmatprep.subr.bf16.mxu1 %v2511_v8 }
 0x2ea   : > { %1853 = vmatprep.mubr.bf16.mxu0 %v3074_v0  ;;  %1894 = vmatprep.mubr.bf16.mxu1 %v3074_v0  ;;  %v2898_v0 = vld [vmem:[#allocation5 + $0x40] sm:$0xff]  }
 0x2ec   : > { %1824 = vmatpush1.bf16.msra.mxu0 %v2508_v16  ;;  %1865 = vmatpush1.bf16.msra.mxu1 %v2510_v17 }
 0x2ed   : > { %1825 = vmatprep.subr.bf16.mxu0 %v2517_v18  ;;  %1866 = vmatprep.subr.bf16.mxu1 %v2519_v21 }
 0x2f0   : > { %1826 = vmatpush1.bf16.msra.mxu0 %v2516_v26  ;;  %1867 = vmatpush1.bf16.msra.mxu1 %v2518_v27  ;;  %v441_v26 = vrot.slane %v403_v25, %v408_v14  ;;  %v449_v27 = vrot.slane %v403_v25, %v416_v15 }
 0x2f1   : > { %1827 = vmatprep.subr.bf16.mxu0 %v2525_v28  ;;  %1868 = vmatprep.subr.bf16.mxu1 %v2527_v29  ;;  %v445_v28 = vrot.slane %v403_v25, %v412_v19 }
 0x2f3   : > { %v1147_v14 = vadd.f32 %v3378_v57, %v445_v28 }
 0x2f4   : > { %1828 = vmatpush1.bf16.msra.mxu0 %v2524_v30  ;;  %1869 = vmatpush1.bf16.msra.mxu1 %v2526_v31  ;;  %v453_v30 = vrot.slane %v403_v25, %v420_v20 }
 0x2f5   : > { %2613 = vmatprep.subr.bf16.mxu0 %v2898_v0  ;;  %2635 = vmatprep.subr.bf16.mxu1 %v2899_v32  ;;  %v1145_v0 = vadd.f32 %v3374_v55, %v441_v26 }
 0x2f6   : > { %v1188_v19 = vadd.f32 %v3380_v58, %v453_v30  ;;  %v2532_v58 = vld [vmem:[%s3560_s6] ss:$0 sm:$0xff] }
 0x2f7   : > { %2530 = vmatmul.mubr.msk.bf16.vlgmr.msra.gmra.mrb[20].mxu0 %vm1536_vm0, %v1543_v6  ;;  %2531 = vmatmul.mubr.msk.bf16.vlgmr.msra.gmra.mrb[20].mxu1 %vm1536_vm0, %v1543_v6 }
 0x2f8   : > { %2614 = vmatpush3.bf16.msra.mxu0 %v2900_v33  ;;  %2636 = vmatpush3.bf16.msra.mxu1 %v2901_v34  ;;  %v1186_v34 = vadd.f32 %v3376_v56, %v449_v27 }
 0x2f9   : > { %2615 = vmatprep.subr.bf16.mxu0 %v2902_v36  ;;  %2637 = vmatprep.subr.bf16.mxu1 %v2903_v37 }
 0x2fc   : > { %2616 = vmatpush3.bf16.msra.mxu0 %v2904_v38  ;;  %2638 = vmatpush3.bf16.msra.mxu1 %v2905_v39 }
 0x2fd   : > { %2617 = vmatprep.subr.bf16.mxu0 %v2906_v40  ;;  %2639 = vmatprep.subr.bf16.mxu1 %v2907_v41 }
 0x300   : > { %2618 = vmatpush3.bf16.msra.mxu0 %v2908_v42  ;;  %2640 = vmatpush3.bf16.msra.mxu1 %v2909_v43 }
 0x301   : > { %2619 = vmatprep.subr.bf16.mxu0 %v2910_v44  ;;  %2641 = vmatprep.subr.bf16.mxu1 %v2911_v35 }
 0x304   : > { %2620 = vmatpush3.bf16.msra.mxu0 %v2912_v45  ;;  %2642 = vmatpush3.bf16.msra.mxu1 %v2913_v46 }
 0x305   : > { %2621 = vmatprep.subr.bf16.mxu0 %v2914_v47  ;;  %2643 = vmatprep.subr.bf16.mxu1 %v2915_v48 }
 0x308   : > { %2622 = vmatpush3.bf16.msra.mxu0 %v2916_v49  ;;  %2644 = vmatpush3.bf16.msra.mxu1 %v2917_v50 }
 0x309   : > { %2623 = vmatprep.subr.bf16.mxu0 %v2918_v51  ;;  %2645 = vmatprep.subr.bf16.mxu1 %v2919_v52 }
 0x30c   : > { %2624 = vmatpush3.bf16.msra.mxu0 %v2920_v53  ;;  %2646 = vmatpush3.bf16.msra.mxu1 %v2921_v54 }
 0x30d   : > { %2625 = vmatprep.subr.bf16.mxu0 %v2922_v59  ;;  %2647 = vmatprep.subr.bf16.mxu1 %v2923_v60 }
 0x310   : > { %2626 = vmatpush3.bf16.msra.mxu0 %v2924_v61  ;;  %2648 = vmatpush3.bf16.msra.mxu1 %v2925_v62 }
 0x311   : > { %2627 = vmatprep.subr.bf16.mxu0 %v2926_v63  ;;  %2649 = vmatprep.subr.bf16.mxu1 %v2927_v1 }
 0x314   : > { %2628 = vmatpush3.bf16.msra.mxu0 %v2928_v2  ;;  %2650 = vmatpush3.bf16.msra.mxu1 %v2929_v3 }
 0x3ba   : > { %v1773_v4 = vpop.f32.mrb[16].mxu0  ;;  %v1814_v5 = vpop.f32.mrb[16].mxu1 }
 0x3bb   : > { %v1775_v6 = vpop.f32.mrb[17].mxu0  ;;  %v1816_v7 = vpop.f32.mrb[17].mxu1 }
 0x3bc   : > { %v1777_v8 = vpop.f32.mrb[18].mxu0  ;;  %v1818_v9 = vpop.f32.mrb[18].mxu1 }
 0x3bd   : > { %v1778_v10 = vpop.f32.mrb[19].mxu0  ;;  %v1819_v11 = vpop.f32.mrb[19].mxu1 }
 0x3ca   : > { %v1855_v12 = vpop.f32.mrb[20].mxu0  ;;  %v1896_v16 = vpop.f32.mrb[20].mxu1 }
 0x3cb   : > { %2932 = vrcp.f32 %v1855_v12  ;;  %v1857_v17 = vpop.f32.mrb[21].mxu0  ;;  %v1898_v18 = vpop.f32.mrb[21].mxu1 }
 0x3cc   : > { %2934 = vrcp.f32 %v1896_v16  ;;  %v1859_v21 = vpop.f32.mrb[22].mxu0  ;;  %v1900_v22 = vpop.f32.mrb[22].mxu1 }
 0x3cd   : > { %2936 = vrcp.f32 %v1857_v17  ;;  %v1860_v23 = vpop.f32.mrb[23].mxu0  ;;  %v1901_v24 = vpop.f32.mrb[23].mxu1 }
 0x3ce   : > { %2938 = vrcp.f32 %v1898_v18 }
 0x3d5   : > { %v2933_v29 = vpop.eup %2932 }
 0x3d6   : > { %v2935_v31 = vpop.eup %2934  ;;  %v1907_v32 = vmul.f32 %v2933_v29, %v1773_v4 }
 0x3d7   : > { %v2937_v33 = vpop.eup %2936  ;;  %v1909_v36 = vmul.f32 %v2935_v31, %v1814_v5 }
 0x3d8   : > { %v2939_v37 = vpop.eup %2938  ;;  %v1908_v15 = vmul.f32 %v2937_v33, %v1775_v6  ;;  %v1911_v38 = vmul.f32 %v1907_v32, %v1145_v0 }
 0x3d9   : > { %v1910_v39 = vmul.f32 %v2939_v37, %v1816_v7  ;;  %v1913_v40 = vmul.f32 %v1909_v36, %v1186_v34 }
 0x3da   : > { %v1912_v13 = vmul.f32 %v1908_v15, %v1147_v14  ;;  %v1915_v55 = vpack.c.bf16 %v1911_v38, %v1911_v38 }
 0x3db   : > { %v1914_v20 = vmul.f32 %v1910_v39, %v1188_v19  ;;  %v1917_v43 = vpack.c.bf16 %v1913_v40, %v1913_v40 }
 0x3dc   : > { %v1916_v41 = vpack.c.bf16 %v1912_v13, %v1912_v13 }
 0x3dd   : > { %v1918_v42 = vpack.c.bf16 %v1914_v20, %v1914_v20 }
 0x3de   : > { %2214 = vmatprep.mubr.bf16.mxu0 %v1916_v41 }
 0x3df   : > { %2254 = vmatprep.mubr.bf16.mxu1 %v1918_v42  ;;  %2215 = vmatmul.mubr.bf16.vlgmr.msra.gmra.mrb[24].mxu0 %v1915_v55 }
 0x3e0   : > { %2255 = vmatmul.mubr.bf16.vlgmr.msra.gmra.mrb[24].mxu1 %v1917_v43 }
 0x4b2   : > { %v2629_v56 = vpop.f32.mrb[24].mxu0 }
 0x4b3   : > { %v2651_v57 = vpop.f32.mrb[24].mxu1  ;;  %v2630_v44 = vpop.f32.mrb[25].mxu0 }
 0x4b4   : > { %v2631_v35 = vadd.f32 %v2630_v44, %v2629_v56  ;;  %v2652_v45 = vpop.f32.mrb[25].mxu1  ;;  %v2632_v46 = vpop.f32.mrb[26].mxu0 }
 0x4b5   : > { %v2653_v47 = vadd.f32 %v2652_v45, %v2651_v57  ;;  %v2654_v48 = vpop.f32.mrb[26].mxu1  ;;  %v2633_v49 = vpop.f32.mrb[27].mxu0 }
 0x4b6   : > { %v2217_v50 = vadd.f32 %v2631_v35, %v2532_v58  ;;  %v2655_v51 = vpop.f32.mrb[27].mxu1 }
 0x4b8   : > { %v2257_v52 = vadd.f32 %v2653_v47, %v2217_v50 }
 0x4ba   : > { %2262 = vst [vmem:[%s299_s29] sm:$0xff] %v2257_v52 }
 0x4bb   : > { %3009 = shalt.err (!%p3006_p11)
}
 0x4bc   : > { %s3010_s16 = scalar_lea.hbm %s3512_s10, 128  ;;  %s3014_s21 = scalar_lea.hbm %s3561_s7, 256 }
 0x4bd   : > { %p3011_p13 = scmp.ne.s32.totalorder %s3512_s10, %s3010_s16  ;;  %p3015_p6 = scmp.lt.u32.totalorder %s3512_s10, %s3561_s7 }
 0x4be   : > { %p3016_p9 = scmp.lt.u32.totalorder %s3014_s21, %s3010_s16  ;;  %p3018_p10 = scmp.lt.u32.totalorder %s3010_s16, %s3512_s10 }
 0x4bf   : > { %p3012_p0 = pnand %p3011_p13, %p3575_p1 }
 0x4c0   : > { %p3017_p12 = por %p3016_p9, %p3015_p6 }
 0x4c1   : > { %p3013_p5 = pneg %p3012_p0 }
 0x4c2   : > { %p3019_p2 = por %p3018_p10, %p3017_p12 }
 0x4c4   : > { %p3020_p3 = pnand %p3019_p2, %p3013_p5 }
 0x4c6   : > { %3023 = shalt.err (!%p3020_p3)
}
 0x4c7   : > { %2665 = dma.vmem_to_hbm [thread:$0]  (%p3575_p1), %s3514_s8, 128, %s3512_s10, %s2264_s14  }
 0x4c8 PF: > { %p2682_p4 = scmp.ge.s32.totalorder %s3066_s27, 2  ;;  %s2289_s29 = sand.u32 1, %s3054_s24  }
 0x4c9   : > { %p3576_p7 = scmp.ne.s32.totalorder %s3567_s12, 0  ;;  %s2290_s9 = scalar_lea.sflag [#allocation4], %s2289_s29 }
 0x4cb   : > { %p2675_p8 = pnand %p2682_p4, %p3576_p7 }
 0x4cd   : > { %3049 = dma.done.wait (!%p2675_p8), %s2290_s9, 128  }
 0x4ce   : > { %3051 = vsyncadd (!%p2675_p8), %s2290_s9, 4294967168  ;;  %s3577_s15 = sld [smem:[#allocation11_spill]]  ;;  %p19_p11 = scmp.ge.s32.totalorder %s3141_s30, 4  }
 0x4cf   : > { %s3578_s24 = smov %s3058_s25  ;;  %s3579_s25 = smov %s3062_s26 }
 0x4d0   : > { %s3581_s27 = smov %s3141_s30  ;;  %21 = sbr.rel (!%p19_p11) target bundleno = 5 (0x5), region = 92 }
 0x4d4   : > { %s3580_s26 = smov %s3577_s15 }
 0x4d7   :  { %2295 = vsyncpa [#allocation3], 1 }
 0x4d8   :  { %2297 = vsyncpa [#allocation3 + $0x1], 1 }
 0x4d9   :  { %2298 = vsyncpa [#allocation6], 1 }
 0x4da   :  { %2299 = vsyncpa [#allocation4], 1 }
 0x4db   :  { %2301 = vsyncpa [#allocation4 + $0x1], 1 }

</bundles_post_ra>
